<compile_context>
chip_gen: v6e
topology: v6e:2x2x1
jax: 0.10.0
libtpu: 0.0.40
codegen_flags: <defaults>
</compile_context>

<pallas_src>
import functools

import jax
import jax.numpy as jnp
from jax import lax
from jax.experimental import pallas as pl
from jax.experimental.pallas import tpu as pltpu

_EPS = 1e-12  # F.normalize default eps


def _round_up(x, m):
    return ((x + m - 1) // m) * m


def _pick_tile(l_pad, d_pad, budget_bytes=24 * 1024 * 1024):
    """Largest 128-multiple tile of the (padded) L axis whose double-buffered
    key+queue f32 blocks fit a conservative VMEM budget (v7x: 64 MiB/TC)."""
    for t in (512, 256, 128):
        if l_pad % t == 0 and 4 * 4 * d_pad * t <= budget_bytes:
            return t
    return 128


def _unfold_nchw(x, ksize, padding, stride):
    """F.unfold for NCHW with PyTorch's channel-major patch ordering.

    Returns (patches (B, C*k*k, L), out_h, out_w). Pure layout plumbing
    (slice/stack/reshape) left to XLA; see TODO(synk) above."""
    B, C, H, W = x.shape
    xp = jnp.pad(x, ((0, 0), (0, 0), (padding, padding), (padding, padding)))
    out_h = (H + 2 * padding - ksize) // stride + 1
    out_w = (W + 2 * padding - ksize) // stride + 1
    rows = []
    for i in range(ksize):
        for j in range(ksize):
            rows.append(xp[:, :, i:i + stride * out_h:stride,
                           j:j + stride * out_w:stride])
    p = jnp.stack(rows, axis=2)  # (B, C, k*k, out_h, out_w)
    return p.reshape(B, C * ksize * ksize, out_h * out_w), out_h, out_w


def attention2_forward(feat_edit, feat_ori, feat_2d=None, *, use_bf16_mxu=False):
    """Attention2.forward: S, T = SearchTransfer(feat_ori, feat_edit, feat_2d); return S."""
    del feat_2d  # the value/T_unfold branch does not affect the returned S
    queue, key = feat_ori, feat_edit
    B, C, H, W = queue.shape

    q_unf, out_h, out_w = _unfold_nchw(queue, ksize=5, padding=1, stride=2)  # (B, D, L)
    k_unf, _, _ = _unfold_nchw(key, ksize=5, padding=1, stride=2)            # (B, D, L)

    D = C * 25
    L = out_h * out_w
    d_pad = _round_up(D, 128)   # zero rows: free for dot products and norms
    l_pad = _round_up(L, 128)   # lane-dense blocks / unmasked output stores

    q_unf = jnp.pad(q_unf, ((0, 0), (0, d_pad - D), (0, l_pad - L)))
    k_unf = jnp.pad(k_unf, ((0, 0), (0, d_pad - D), (0, l_pad - L)))

    tq = tk = _pick_tile(l_pad, d_pad)
    num_q = l_pad // tq
    num_k = l_pad // tk
    mask_keys = l_pad != L  # padded key rows must not win the max

    # Raise the scoped-VMEM limit above the v5e 16 MiB default; cap at 64 MiB
    # so the plan also fits v7x's per-TC physical VMEM.
    est = 4 * (2 * d_pad * tk + 2 * d_pad * tq + 8 * tq)
    vmem_limit = int(min(max(2 * est, 32 * 1024 * 1024), 64 * 1024 * 1024))

    def kernel(key_ref, queue_ref, s_ref, m_ref, qrn_ref):
        # key_ref:   (d_pad, tk)  key patch columns (un-normalized)
        # queue_ref: (d_pad, tq)  queue patch columns (resident across ki)
        # s_ref:     (1, tq)      output block (resident across ki)
        # m_ref:     (1, tq)      running max over key tiles
        # qrn_ref:   (1, tq)      deferred queue 1/max(||q||, eps)
        ki = pl.program_id(2)

        @pl.when(ki == 0)
        def _init():
            q0 = queue_ref[...].astype(jnp.float32)
            qss = jnp.sum(q0 * q0, axis=0, keepdims=True)            # (1, tq)
            qrn_ref[...] = lax.rsqrt(jnp.maximum(qss, _EPS * _EPS))  # EUP
            m_ref[...] = jnp.full(m_ref.shape, -jnp.inf, dtype=m_ref.dtype)

        # Normalize key columns (cannot be deferred past the max): rsqrt on the
        # clamped squared norm == 1/max(||k||, eps); (1, tk) sublane-broadcast.
        k = key_ref[...].astype(jnp.float32)
        kss = jnp.sum(k * k, axis=0, keepdims=True)                  # (1, tk)
        k_n = k * lax.rsqrt(jnp.maximum(kss, _EPS * _EPS))           # (d_pad, tk)

        q = queue_ref[...].astype(jnp.float32)                       # un-normalized
        if use_bf16_mxu:  # optional v6e/v7x fast path; f32 accumulation kept
            k_n = k_n.astype(jnp.bfloat16)
            q = q.astype(jnp.bfloat16)

        # R[i, j] = <k_norm_i, q_j>: contract dim 0 of both operands (no
        # transpose anywhere, neither in HBM nor VMEM) -> (tk, tq) on the MXU.
        r = lax.dot_general(k_n, q, (((0,), (0,)), ((), ())),
                            preferred_element_type=jnp.float32)

        if mask_keys:
            key_idx = ki * tk + lax.broadcasted_iota(jnp.int32, r.shape, 0)
            r = jnp.where(key_idx < L, r, -jnp.inf)

        m_ref[...] = jnp.maximum(m_ref[...], jnp.max(r, axis=0, keepdims=True))

        @pl.when(ki == pl.num_programs(2) - 1)
        def _finish():
            # Deferred queue normalization: positive per-column scale commutes
            # with the max over keys, so applying it to the (1, tq) max is exact.
            s_ref[...] = (m_ref[...] * qrn_ref[...]).astype(s_ref.dtype)

    s_pad = pl.pallas_call(
        kernel,
        out_shape=jax.ShapeDtypeStruct((B, 1, l_pad), queue.dtype),
        grid=(B, num_q, num_k),
        in_specs=[
            pl.BlockSpec((None, d_pad, tk), lambda b, qi, ki: (b, 0, ki)),  # key
            pl.BlockSpec((None, d_pad, tq), lambda b, qi, ki: (b, 0, qi)),  # queue
        ],
        out_specs=pl.BlockSpec((None, 1, tq), lambda b, qi, ki: (b, 0, qi)),
        scratch_shapes=[
            pltpu.VMEM((1, tq), jnp.float32),  # running max
            pltpu.VMEM((1, tq), jnp.float32),  # queue rsqrt norms
        ],
        compiler_params=pltpu.CompilerParams(
            dimension_semantics=("parallel", "parallel", "arbitrary"),
            vmem_limit_bytes=vmem_limit,
        ),
    )(k_unf, q_unf)

    # TODO(synk): the original R_star.view(B, 1, H, W) is shape-inconsistent
    # (one entry per 5x5/stride-2 patch, not per pixel); we reshape to the
    # (B, 1, out_h, out_w) patch grid, as the sibling Attention module does.
    return s_pad[:, 0, :L].reshape(B, 1, out_h, out_w)


def _reference(feat_edit, feat_ori, feat_2d=None):
    """Pure-JAX reference (un-padded, un-fused) for validation."""
    queue, key = feat_ori, feat_edit
    q_unf, out_h, out_w = _unfold_nchw(queue, 5, 1, 2)
    k_unf, _, _ = _unfold_nchw(key, 5, 1, 2)
    k_unf = jnp.transpose(k_unf, (0, 2, 1))
    k_n = k_unf / jnp.maximum(
        jnp.sqrt(jnp.sum(k_unf * k_unf, axis=2, keepdims=True)), _EPS)
    q_n = q_unf / jnp.maximum(
        jnp.sqrt(jnp.sum(q_unf * q_unf, axis=1, keepdims=True)), _EPS)
    r = jnp.einsum("bld,bdm->blm", k_n, q_n)
    r_star = jnp.max(r, axis=1)
    return r_star.reshape(queue.shape[0], 1, out_h, out_w)


if __name__ == "__main__":
    k1, k2, k3 = jax.random.split(jax.random.PRNGKey(0), 3)
    shape = (2, 4, 16, 16)  # B, C, H, W
    feat_edit = jax.random.normal(k1, shape, dtype=jnp.float32)
    feat_ori = jax.random.normal(k2, shape, dtype=jnp.float32)
    feat_2d = jax.random.normal(k3, shape, dtype=jnp.float32)

    fwd = jax.jit(functools.partial(attention2_forward))
    out = jax.block_until_ready(fwd(feat_edit, feat_ori, feat_2d))

    ref = _reference(feat_edit, feat_ori, feat_2d)
    assert out.shape == ref.shape and out.dtype == ref.dtype, (out.shape, out.dtype)
    max_err = float(jnp.max(jnp.abs(out - ref)))
    assert jnp.allclose(out, ref, atol=1e-4, rtol=1e-4), max_err

    print("KERNEL_OK")
</pallas_src>

<mosaic_0001>
module attributes {stable_mosaic.version = 11 : i64} {
  func.func @kernel(%arg0: i32, %arg1: i32, %arg2: i32, %arg3: memref<1x128x128xf32, #tpu.memory_space<vmem>>, %arg4: memref<1x128x128xf32, #tpu.memory_space<vmem>>, %arg5: memref<1x1x128xf32, #tpu.memory_space<vmem>>, %arg6: memref<1x128xf32, #tpu.memory_space<vmem>>, %arg7: memref<1x128xf32, #tpu.memory_space<vmem>>) attributes {dimension_semantics = [#tpu.dimension_semantics<parallel>, #tpu.dimension_semantics<parallel>, #tpu.dimension_semantics<arbitrary>], iteration_bounds = array<i64: 2, 1, 1>, scalar_prefetch = 0 : i64, scratch_operands = 2 : i64, tpu.core_type = #tpu.core_type<tc>, window_params = [{transform_indices = @transform_0, window_bounds = array<i64: 1, 128, 128>}, {transform_indices = @transform_1, window_bounds = array<i64: 1, 128, 128>}, {transform_indices = @transform_2, window_bounds = array<i64: 1, 1, 128>}]} {
    %c0_i32 = arith.constant 0 : i32
    %0 = arith.cmpi eq, %arg2, %c0_i32 : i32
    %1 = arith.extui %0 : i1 to i32
    %c0_i32_0 = arith.constant 0 : i32
    %2 = arith.cmpi ne, %1, %c0_i32_0 : i32
    scf.if %2 {
      %c0_16 = arith.constant 0 : index
      %c0_17 = arith.constant 0 : index
      %c0_18 = arith.constant 0 : index
      %32 = vector.load %arg4[%c0_16, %c0_17, %c0_18] : memref<1x128x128xf32, #tpu.memory_space<vmem>>, vector<1x128x128xf32>
      %33 = vector.shape_cast %32 : vector<1x128x128xf32> to vector<128x128xf32>
      %34 = arith.mulf %33, %33 : vector<128x128xf32>
      %cst_19 = arith.constant dense<0.000000e+00> : vector<128xf32>
      %35 = vector.multi_reduction <add>, %34, %cst_19 [0] : vector<128x128xf32> to vector<128xf32>
      %36 = vector.shape_cast %35 : vector<128xf32> to vector<1x128xf32>
      %cst_20 = arith.constant 1.000000e-24 : f32
      %37 = vector.broadcast %cst_20 : f32 to vector<1x128xf32>
      %38 = arith.maximumf %36, %37 : vector<1x128xf32>
      %39 = math.rsqrt %38 : vector<1x128xf32>
      %c0_21 = arith.constant 0 : index
      %c0_22 = arith.constant 0 : index
      %40 = vector.load %arg7[%c0_21, %c0_22] : memref<1x128xf32, #tpu.memory_space<vmem>>, vector<1x128xf32>
      tpu.vector_store %arg7[%c0_21, %c0_22], %39 {strides = array<i32>} : memref<1x128xf32, #tpu.memory_space<vmem>>, vector<1x128xf32>,
      %cst_23 = arith.constant 0xFF800000 : f32
      %41 = vector.broadcast %cst_23 : f32 to vector<1x128xf32>
      %c0_24 = arith.constant 0 : index
      %c0_25 = arith.constant 0 : index
      %42 = vector.load %arg6[%c0_24, %c0_25] : memref<1x128xf32, #tpu.memory_space<vmem>>, vector<1x128xf32>
      tpu.vector_store %arg6[%c0_24, %c0_25], %41 {strides = array<i32>} : memref<1x128xf32, #tpu.memory_space<vmem>>, vector<1x128xf32>,
    } else {
    }
    %c0 = arith.constant 0 : index
    %c0_1 = arith.constant 0 : index
    %c0_2 = arith.constant 0 : index
    %3 = vector.load %arg3[%c0, %c0_1, %c0_2] : memref<1x128x128xf32, #tpu.memory_space<vmem>>, vector<1x128x128xf32>
    %4 = vector.shape_cast %3 : vector<1x128x128xf32> to vector<128x128xf32>
    %5 = arith.mulf %4, %4 : vector<128x128xf32>
    %cst = arith.constant dense<0.000000e+00> : vector<128xf32>
    %6 = vector.multi_reduction <add>, %5, %cst [0] : vector<128x128xf32> to vector<128xf32>
    %7 = vector.shape_cast %6 : vector<128xf32> to vector<1x128xf32>
    %cst_3 = arith.constant 1.000000e-24 : f32
    %8 = vector.broadcast %cst_3 : f32 to vector<1x128xf32>
    %9 = arith.maximumf %7, %8 : vector<1x128xf32>
    %10 = math.rsqrt %9 : vector<1x128xf32>
    %11 = vector.broadcast %10 : vector<1x128xf32> to vector<128x128xf32>
    %12 = arith.mulf %4, %11 : vector<128x128xf32>
    %c0_4 = arith.constant 0 : index
    %c0_5 = arith.constant 0 : index
    %c0_6 = arith.constant 0 : index
    %13 = vector.load %arg4[%c0_4, %c0_5, %c0_6] : memref<1x128x128xf32, #tpu.memory_space<vmem>>, vector<1x128x128xf32>
    %14 = vector.shape_cast %13 : vector<1x128x128xf32> to vector<128x128xf32>
    %cst_7 = arith.constant dense<0.000000e+00> : vector<128x128xf32>
    %15 = tpu.matmul %12, %14, %cst_7 {dimension_numbers = #tpu.dot_dimension_numbers<[0], [0], [1], [1], [0, 1, 1, 1], [], []>} : vector<128x128xf32>, vector<128x128xf32>, vector<128x128xf32> -> vector<128x128xf32>
    %c128_i32 = arith.constant 128 : i32
    %16 = arith.muli %arg2, %c128_i32 : i32
    %17 = tpu.iota {dimensions = array<i32: 0>} : vector<128x128xi32>
    %18 = vector.broadcast %16 : i32 to vector<128x128xi32>
    %19 = arith.addi %18, %17 : vector<128x128xi32>
    %c49_i32 = arith.constant 49 : i32
    %20 = vector.broadcast %c49_i32 : i32 to vector<128x128xi32>
    %21 = arith.cmpi slt, %19, %20 : vector<128x128xi32>
    %cst_8 = arith.constant 0xFF800000 : f32
    %22 = vector.broadcast %cst_8 : f32 to vector<128x128xf32>
    %23 = arith.select %21, %15, %22 : vector<128x128xi1>, vector<128x128xf32>
    %c0_9 = arith.constant 0 : index
    %c0_10 = arith.constant 0 : index
    %24 = vector.load %arg6[%c0_9, %c0_10] : memref<1x128xf32, #tpu.memory_space<vmem>>, vector<1x128xf32>
    %cst_11 = arith.constant dense<0xFF800000> : vector<128xf32>
    %25 = vector.multi_reduction <maximumf>, %23, %cst_11 [0] : vector<128x128xf32> to vector<128xf32>
    %26 = vector.shape_cast %25 : vector<128xf32> to vector<1x128xf32>
    %27 = arith.maximumf %24, %26 : vector<1x128xf32>
    %c0_12 = arith.constant 0 : index
    %c0_13 = arith.constant 0 : index
    %28 = vector.load %arg6[%c0_12, %c0_13] : memref<1x128xf32, #tpu.memory_space<vmem>>, vector<1x128xf32>
    tpu.vector_store %arg6[%c0_12, %c0_13], %27 {strides = array<i32>} : memref<1x128xf32, #tpu.memory_space<vmem>>, vector<1x128xf32>,
    %c0_i32_14 = arith.constant 0 : i32
    %29 = arith.cmpi eq, %arg2, %c0_i32_14 : i32
    %30 = arith.extui %29 : i1 to i32
    %c0_i32_15 = arith.constant 0 : i32
    %31 = arith.cmpi ne, %30, %c0_i32_15 : i32
    scf.if %31 {
      %c0_16 = arith.constant 0 : index
      %c0_17 = arith.constant 0 : index
      %32 = vector.load %arg6[%c0_16, %c0_17] : memref<1x128xf32, #tpu.memory_space<vmem>>, vector<1x128xf32>
      %c0_18 = arith.constant 0 : index
      %c0_19 = arith.constant 0 : index
      %33 = vector.load %arg7[%c0_18, %c0_19] : memref<1x128xf32, #tpu.memory_space<vmem>>, vector<1x128xf32>
      %34 = arith.mulf %32, %33 : vector<1x128xf32>
      %c0_20 = arith.constant 0 : index
      %c0_21 = arith.constant 0 : index
      %c0_22 = arith.constant 0 : index
      %35 = vector.load %arg5[%c0_20, %c0_21, %c0_22] : memref<1x1x128xf32, #tpu.memory_space<vmem>>, vector<1x1x128xf32>
      %36 = vector.shape_cast %35 : vector<1x1x128xf32> to vector<1x128xf32>
      %37 = vector.shape_cast %34 : vector<1x128xf32> to vector<1x1x128xf32>
      tpu.vector_store %arg5[%c0_20, %c0_21, %c0_22], %37 {strides = array<i32>} : memref<1x1x128xf32, #tpu.memory_space<vmem>>, vector<1x1x128xf32>,
    } else {
    }
    return
  }
  func.func @transform_0(%arg0: i32, %arg1: i32, %arg2: i32) -> (i32, i32, i32) {
    %c0_i32 = arith.constant 0 : i32
    %c0_i32_0 = arith.constant 0 : i32
    return %arg0, %c0_i32, %arg2 : i32, i32, i32
  }
  func.func @transform_1(%arg0: i32, %arg1: i32, %arg2: i32) -> (i32, i32, i32) {
    %c0_i32 = arith.constant 0 : i32
    %c0_i32_0 = arith.constant 0 : i32
    return %arg0, %c0_i32, %arg1 : i32, i32, i32
  }
  func.func @transform_2(%arg0: i32, %arg1: i32, %arg2: i32) -> (i32, i32, i32) {
    %c0_i32 = arith.constant 0 : i32
    %c0_i32_0 = arith.constant 0 : i32
    return %arg0, %c0_i32, %arg1 : i32, i32, i32
  }
}

</mosaic_0001>

<bundles_post_ra>
// kernel: squeeze.0
= control target key start
LH: loop header
LB: loop body
LE: loop exit
PB: predicated region body
PF: predicated region fallthrough
CT: control target
= control target key end

     0   :  { %s236_s0 = inlined_call_operand.vmem [shape: f32[2,49], index: 0, kind: input, shape index: {}]   ;;  %s237_s1 = inlined_call_operand.hbm [shape: f32[2,1,7,7], index: 1, kind: output, shape index: {}]  }
   0x1   :  { %v6_v0 = vld [vmem:[%s236_s0] sm:$0x3] }
   0x2   :  { %7 = vst [vmem:[#allocation3] sm:$0x3] %v6_v0 }
   0x3   :  { %2 = vsyncpa [#allocation1], 0  ;;  %s28_s0 = smov 3  ;;  %s12_s8 = smov 3  ;;  %vm9_vm0 = vcmask 56320  }
   0x4   :  { %s20_s9 = smov 3  ;;  %s206_s10 = smov 107  }
   0x5   :  { %s207_s11 = smov 121   ;;  %s50_s12 = smov 3 }
   0x6   :  { %s42_s13 = smov 3  ;;  %s208_s14 = smov 100  }
   0x7   :  { %s209_s15 = smov 114   ;;  %s210_s16 = smov 86  }
   0x8   :  { %s211_s17 = smov 93   ;;  %s212_s18 = smov [#allocation0]  }
   0x9   :  { %v29_v1 = vld [vmem:[#allocation3 + $0x1] ss:$-1 sm:%s28_s0]   ;;  %s159_s19 = sshll.u32 %s212_s18, 4  ;;  %s160_s19 = int_to_ptr.vmem [resolvable:$true] %s159_s19 }
   0xa   :  { %v13_v2 = vld [vmem:[#allocation3 + $0x1] ss:$-1 sm:%s12_s8]   ;;  %30 = vrot.lane.b32.xlu1 %v29_v1, %s206_s10  ;;  %s184_s20 = scalar_lea.vmem %s160_s19, 224  ;;  %p189_p1 = scmp.lt.s32.totalorder %s160_s19, %s160_s19 }
   0xb   :  { %14 = vrot.lane.b32.xlu0 %v13_v2, %s207_s11  ;;  %v8_v3 = vld [vmem:[#allocation3] sm:$0x3]   ;;  %p185_p0 = scmp.ne.s32.totalorder %s160_s19, %s184_s20  ;;  %p190_p2 = scmp.lt.s32.totalorder %s184_s20, %s184_s20 }
   0xc   :  { %v35_v4 = vld [vmem:[#allocation3] sm:$0x3]   ;;  %10 = vst.msk [vmem:[#allocation2] ss:$56 sm:$0x3] %vm9_vm0, %v8_v3  }
   0xd   :  { %v21_v5 = vld [vmem:[#allocation3 + $0x1] ss:$-1 sm:%s20_s9]   ;;  %p191_p3 = por %p190_p2, %p189_p1 }
   0xe   :  { %36 = vrot.lane.b32.xlu1 %v35_v4, %s208_s14  ;;  %v51_v6 = vld [vmem:[#allocation3 + $0x1] ss:$-1 sm:%s50_s12]  }
   0xf   :  { %22 = vrot.lane.b32.xlu0 %v21_v5, %s209_s15  ;;  %v43_v7 = vld [vmem:[#allocation3 + $0x1] ss:$-1 sm:%s42_s13]   ;;  %p192_p4 = pnand %p191_p3, %p185_p0 }
  0x12   :  { %52 = vrot.lane.b32.xlu1 %v51_v6, %s210_s16 }
  0x13   :  { %44 = vrot.lane.b32.xlu0 %v43_v7, %s211_s17  ;;  %v61_v8 = vld [vmem:[#allocation2] sm:$0x1]  ;;  %v107_v9 = vld [vmem:[#allocation2 + $0x38] sm:$0x1] }
  0x14   :  { %64 = vst [vmem:[#allocation0] sm:$0x1] %v61_v8  ;;  %112 = vst [vmem:[#allocation0 + $0x7] sm:$0x1] %v107_v9 }
  0x7c   :  { %v31_v10 = vpop.permute.xlu1 %30  }
  0x7d   :  { %v15_v11 = vpop.permute.xlu0 %14   ;;  %34 = vst.msk [vmem:[#allocation2 + $0x50] ss:$-56 sm:$0x3] %vm9_vm0, %v31_v10  }
  0x7e   :  { %18 = vst.msk [vmem:[#allocation2 + $0x40] ss:$-56 sm:$0x3] %vm9_vm0, %v15_v11  }
  0x80   :  { %v37_v12 = vpop.permute.xlu1 %36  }
  0x81   :  { %v23_v13 = vpop.permute.xlu0 %22   ;;  %40 = vst.msk [vmem:[#allocation2 + $0x20] ss:$56 sm:$0x3] %vm9_vm0, %v37_v12  }
  0x82   :  { %26 = vst.msk [vmem:[#allocation2 + $0x48] ss:$-56 sm:$0x3] %vm9_vm0, %v23_v13  }
  0x84   :  { %v79_v14 = vld [vmem:[#allocation2 + $0x18] sm:$0x1]  ;;  %v128_v15 = vld [vmem:[#allocation2 + $0x50] sm:$0x1]  ;;  %v53_v17 = vpop.permute.xlu1 %52  }
  0x85   :  { %v66_v16 = vld [vmem:[#allocation2 + $0x8] sm:$0x1]  ;;  %v45_v18 = vpop.permute.xlu0 %44   ;;  %84 = vst [vmem:[#allocation0 + $0x3] sm:$0x1] %v79_v14  ;;  %133 = vst [vmem:[#allocation0 + $0xa] sm:$0x1] %v128_v15 }
  0x86   :  { %70 = vst [vmem:[#allocation0 + $0x1] sm:$0x1] %v66_v16  ;;  %v114_v19 = vld [vmem:[#allocation2 + $0x40] sm:$0x1] }
  0x87   :  { %56 = vst.msk [vmem:[#allocation2 + $0x68] ss:$-56 sm:$0x3] %vm9_vm0, %v53_v17   ;;  %48 = vst.msk [vmem:[#allocation2 + $0x60] ss:$-56 sm:$0x3] %vm9_vm0, %v45_v18  }
  0x88   :  { %119 = vst [vmem:[#allocation0 + $0x8] sm:$0x1] %v114_v19  ;;  %v86_v20 = vld [vmem:[#allocation2 + $0x20] sm:$0x1]  ;;  %v135_v21 = vld [vmem:[#allocation2 + $0x58] sm:$0x1] }
  0x89   :  { %v72_v22 = vld [vmem:[#allocation2 + $0x10] sm:$0x1]  ;;  %91 = vst [vmem:[#allocation0 + $0x4] sm:$0x1] %v86_v20  ;;  %140 = vst [vmem:[#allocation0 + $0xb] sm:$0x1] %v135_v21 }
  0x8a   :  { %77 = vst [vmem:[#allocation0 + $0x2] sm:$0x1] %v72_v22  ;;  %v121_v23 = vld [vmem:[#allocation2 + $0x48] sm:$0x1] }
  0x8b   :  { %126 = vst [vmem:[#allocation0 + $0x9] sm:$0x1] %v121_v23 }
  0x8e   :  { %v100_v24 = vld [vmem:[#allocation2 + $0x30] sm:$0x1]  ;;  %v149_v25 = vld [vmem:[#allocation2 + $0x68] sm:$0x1]  ;;  %v142_v27 = vld [vmem:[#allocation2 + $0x60] sm:$0x1] }
  0x8f   :  { %v93_v26 = vld [vmem:[#allocation2 + $0x28] sm:$0x1]  ;;  %105 = vst [vmem:[#allocation0 + $0x6] sm:$0x1] %v100_v24  ;;  %154 = vst [vmem:[#allocation0 + $0xd] sm:$0x1] %v149_v25 }
  0x90   :  { %98 = vst [vmem:[#allocation0 + $0x5] sm:$0x1] %v93_v26  ;;  %147 = vst [vmem:[#allocation0 + $0xc] sm:$0x1] %v142_v27 }
  0x91   :  { %195 = shalt.err (!%p192_p4)
}
  0x92   :  { %162 = dma.vmem_to_hbm [thread:$0]  %s160_s19, 224, %s237_s1, [#allocation1]  }
  0x93   :  { %204 = dma.done.wait [#allocation1], 224  }
  0x94   :  { %205 = vsyncadd [#allocation1], 4294967072 }
  0x95   :  { %164 = vsyncpa [#allocation1], 1 }

// kernel: attention2_forward.1
= control target key start
LH: loop header
LB: loop body
LE: loop exit
PB: predicated region body
PF: predicated region fallthrough
CT: control target
= control target key end

     0   :  { %s926_s9 = smov 0   ;;  %s928_s10 = smov 0   ;;  %s1200_s0 = inlined_call_operand.vmem [shape: f32[2,128,128], index: 0, kind: input, shape index: {}]   ;;  %s1201_s1 = inlined_call_operand.vmem [shape: f32[2,128,128], index: 1, kind: input, shape index: {}]   ;;  %s1202_s2 = inlined_call_operand.vmem [shape: f32[2,1,128], index: 2, kind: output, shape index: {}]  }
   0x1   :  { %s930_s11 = smov 0  }
   0x2 LB: > { %s31_s12 = sadd.s32 1, %s904_s10  ;;  %p728_p0 = scmp.ge.s32.totalorder %s908_s11, 1  ;;  %s908_s11 = sphi %s930_s11, %s12_s11   ;;  %s904_s10 = sphi %s928_s10, %s1204_s10   ;;  %s900_s9 = sphi %s926_s9, %s1203_s9  }
   0x3   : > { %p33_p1 = scmp.ge.s32.totalorder %s31_s12, 2  ;;  %p153_p2 = scmp.lt.s32.totalorder %s908_s11, 3 }
   0x5   : > { %s1206_s12 = smov (%p33_p1, %s31_s12), 0  ;;  %p154_p3 = pnand %p728_p0, %p153_p2 }
   0x6   : > { %p187_p4 = scmp.lt.s32.totalorder (!%p154_p3), %s900_s9, 1 }
   0x7   : > { %157 = sbr.rel (%p154_p3) target bundleno = 458 (0x1ca), region = 28 }
   0xc   : > { %s1208_s9 = smov (!%p187_p4, %s900_s9), 1 }
   0xd   : > { %s735_s13 = sshll.u32 %s1208_s9, 7  ;;  %s208_s22 = scalar_lea.vmem %s1202_s2, %s1208_s9 }
   0xe   : > { %s950_s16 = scalar_lea.vmem %s1200_s0, %s735_s13  ;;  %s973_s19 = scalar_lea.vmem %s1201_s1, %s735_s13 }
   0xf   : > { %v953_v0 = vld [vmem:[%s950_s16] sm:$0xff]  ;;  %v956_v1 = vld [vmem:[%s950_s16 + $0x8] sm:$0xff]  ;;  %v959_v2 = vld [vmem:[%s950_s16 + $0x10] sm:$0xff] }
  0x10   : > { %v962_v3 = vld [vmem:[%s950_s16 + $0x18] sm:$0xff]  ;;  %v286_v4 = vmul.f32 %v953_v0, %v953_v0  ;;  %v287_v5 = vmul.f32 %v956_v1, %v956_v1  ;;  %v288_v6 = vmul.f32 %v959_v2, %v959_v2  ;;  %v976_v7 = vld [vmem:[%s950_s16 + $0x20] sm:$0xff]  ;;  %v981_v10 = vld [vmem:[%s950_s16 + $0x28] sm:$0xff] }
  0x11   : > { %v289_v8 = vmul.f32 %v962_v3, %v962_v3  ;;  %v290_v11 = vmul.f32 %v976_v7, %v976_v7  ;;  %v986_v13 = vld [vmem:[%s973_s19 + $0x78] sm:$0xff]  ;;  %v989_v14 = vld [vmem:[%s973_s19 + $0x70] sm:$0xff]  ;;  %v291_v16 = vmul.f32 %v981_v10, %v981_v10  ;;  %v1000_v18 = vld [vmem:[%s973_s19 + $0x68] sm:$0xff] }
  0x12   : > { %v302_v9 = vadd.f32 %v287_v5, %v286_v4  ;;  %v992_v15 = vld [vmem:[%s950_s16 + $0x30] sm:$0xff]  ;;  %769 = vmatprep.subr.mxu0 %v986_v13  ;;  %825 = vmatprep.subr.mxu1 %v986_v13  ;;  %v1004_v19 = vld [vmem:[%s950_s16 + $0x38] sm:$0xff]  ;;  %v1012_v22 = vld [vmem:[%s973_s19 + $0x60] sm:$0xff] }
  0x13   : > { %770 = vmatpush3.msra.mxu0 %v986_v13  ;;  %841 = vmatpush3.msra.mxu1 %v986_v13  ;;  %v292_v20 = vmul.f32 %v992_v15, %v992_v15  ;;  %v1016_v23 = vld [vmem:[%s950_s16 + $0x40] sm:$0xff]  ;;  %v293_v24 = vmul.f32 %v1004_v19, %v1004_v19  ;;  %v1024_v26 = vld [vmem:[%s973_s19 + $0x58] sm:$0xff]  ;;  %v1028_v27 = vld [vmem:[%s950_s16 + $0x48] sm:$0xff] }
  0x14   : > { %v303_v12 = vadd.f32 %v302_v9, %v288_v6  ;;  %771 = vmatprep.subr.mxu0 %v989_v14  ;;  %826 = vmatprep.subr.mxu1 %v989_v14  ;;  %v294_v28 = vmul.f32 %v1016_v23, %v1016_v23  ;;  %v1036_v30 = vld [vmem:[%s973_s19 + $0x50] sm:$0xff]  ;;  %v295_v32 = vmul.f32 %v1028_v27, %v1028_v27  ;;  %v1048_v34 = vld [vmem:[%s973_s19 + $0x48] sm:$0xff]  ;;  %v1052_v35 = vld [vmem:[%s950_s16 + $0x58] sm:$0xff] }
  0x15   : > { %772 = vmatpush3.msra.mxu0 %v989_v14  ;;  %842 = vmatpush3.msra.mxu1 %v989_v14  ;;  %v1040_v31 = vld [vmem:[%s950_s16 + $0x50] sm:$0xff]  ;;  %v1060_v38 = vld [vmem:[%s973_s19 + $0x40] sm:$0xff]  ;;  %v297_v40 = vmul.f32 %v1052_v35, %v1052_v35  ;;  %v1072_v42 = vld [vmem:[%s973_s19 + $0x38] sm:$0xff] }
  0x16   : > { %v304_v17 = vadd.f32 %v303_v12, %v289_v8  ;;  %773 = vmatprep.subr.mxu0 %v1000_v18  ;;  %827 = vmatprep.subr.mxu1 %v1000_v18  ;;  %v296_v36 = vmul.f32 %v1040_v31, %v1040_v31  ;;  %v1064_v39 = vld [vmem:[%s950_s16 + $0x60] sm:$0xff]  ;;  %v1076_v43 = vld [vmem:[%s950_s16 + $0x68] sm:$0xff]  ;;  %v1084_v46 = vld [vmem:[%s973_s19 + $0x30] sm:$0xff] }
  0x17   : > { %774 = vmatpush3.msra.mxu0 %v1000_v18  ;;  %843 = vmatpush3.msra.mxu1 %v1000_v18  ;;  %v298_v44 = vmul.f32 %v1064_v39, %v1064_v39  ;;  %v284_v47 = vld [vmem:[%s950_s16 + $0x70] sm:$0xff]  ;;  %v299_v48 = vmul.f32 %v1076_v43, %v1076_v43  ;;  %v1094_v50 = vld [vmem:[%s973_s19 + $0x28] sm:$0xff]  ;;  %v285_v51 = vld [vmem:[%s950_s16 + $0x78] sm:$0xff] }
  0x18   : > { %v305_v21 = vadd.f32 %v304_v17, %v290_v11  ;;  %775 = vmatprep.subr.mxu0 %v1012_v22  ;;  %828 = vmatprep.subr.mxu1 %v1012_v22  ;;  %v300_v52 = vmul.f32 %v284_v47, %v284_v47  ;;  %v1102_v54 = vld [vmem:[%s973_s19 + $0x20] sm:$0xff]  ;;  %v301_v55 = vmul.f32 %v285_v51, %v285_v51  ;;  %v1109_v57 = vld [vmem:[%s973_s19 + $0x18] sm:$0xff]  ;;  %v1116_v59 = vld [vmem:[%s973_s19 + $0x10] sm:$0xff] }
  0x19   : > { %776 = vmatpush3.msra.mxu0 %v1012_v22  ;;  %844 = vmatpush3.msra.mxu1 %v1012_v22  ;;  %v1128_v9 = vld [vmem:[%s973_s19 + $0x8] sm:$0xff]  ;;  %v1132_v12 = vld [vmem:[%s973_s19] sm:$0xff] }
  0x1a   : > { %v306_v25 = vadd.f32 %v305_v21, %v291_v16  ;;  %777 = vmatprep.subr.mxu0 %v1024_v26  ;;  %829 = vmatprep.subr.mxu1 %v1024_v26 }
  0x1b   : > { %778 = vmatpush3.msra.mxu0 %v1024_v26  ;;  %845 = vmatpush3.msra.mxu1 %v1024_v26 }
  0x1c   : > { %v307_v29 = vadd.f32 %v306_v25, %v292_v20  ;;  %779 = vmatprep.subr.mxu0 %v1036_v30  ;;  %830 = vmatprep.subr.mxu1 %v1036_v30 }
  0x1d   : > { %780 = vmatpush3.msra.mxu0 %v1036_v30  ;;  %846 = vmatpush3.msra.mxu1 %v1036_v30 }
  0x1e   : > { %v308_v33 = vadd.f32 %v307_v29, %v293_v24  ;;  %781 = vmatprep.subr.mxu0 %v1048_v34  ;;  %831 = vmatprep.subr.mxu1 %v1048_v34 }
  0x1f   : > { %782 = vmatpush3.msra.mxu0 %v1048_v34  ;;  %847 = vmatpush3.msra.mxu1 %v1048_v34 }
  0x20   : > { %v309_v37 = vadd.f32 %v308_v33, %v294_v28  ;;  %783 = vmatprep.subr.mxu0 %v1060_v38  ;;  %832 = vmatprep.subr.mxu1 %v1060_v38 }
  0x21   : > { %784 = vmatpush3.msra.mxu0 %v1060_v38  ;;  %848 = vmatpush3.msra.mxu1 %v1060_v38 }
  0x22   : > { %v310_v41 = vadd.f32 %v309_v37, %v295_v32  ;;  %785 = vmatprep.subr.mxu0 %v1072_v42  ;;  %833 = vmatprep.subr.mxu1 %v1072_v42 }
  0x23   : > { %786 = vmatpush3.msra.mxu0 %v1072_v42  ;;  %849 = vmatpush3.msra.mxu1 %v1072_v42 }
  0x24   : > { %v311_v45 = vadd.f32 %v310_v41, %v296_v36  ;;  %787 = vmatprep.subr.mxu0 %v1084_v46  ;;  %834 = vmatprep.subr.mxu1 %v1084_v46 }
  0x25   : > { %788 = vmatpush3.msra.mxu0 %v1084_v46  ;;  %850 = vmatpush3.msra.mxu1 %v1084_v46 }
  0x26   : > { %v312_v49 = vadd.f32 %v311_v45, %v297_v40  ;;  %789 = vmatprep.subr.mxu0 %v1094_v50  ;;  %835 = vmatprep.subr.mxu1 %v1094_v50 }
  0x27   : > { %790 = vmatpush3.msra.mxu0 %v1094_v50  ;;  %851 = vmatpush3.msra.mxu1 %v1094_v50 }
  0x28   : > { %v313_v53 = vadd.f32 %v312_v49, %v298_v44  ;;  %791 = vmatprep.subr.mxu0 %v1102_v54  ;;  %836 = vmatprep.subr.mxu1 %v1102_v54  ;;  %v230_v49 = vmul.f32 %v1128_v9, %v1128_v9 }
  0x29   : > { %792 = vmatpush3.msra.mxu0 %v1102_v54  ;;  %852 = vmatpush3.msra.mxu1 %v1102_v54 }
  0x2a   : > { %v314_v56 = vadd.f32 %v313_v53, %v299_v48  ;;  %793 = vmatprep.subr.mxu0 %v1109_v57  ;;  %837 = vmatprep.subr.mxu1 %v1109_v57  ;;  %v229_v48 = vmul.f32 %v1132_v12, %v1132_v12 }
  0x2b   : > { %794 = vmatpush3.msra.mxu0 %v1109_v57  ;;  %853 = vmatpush3.msra.mxu1 %v1109_v57 }
  0x2c   : > { %v315_v58 = vadd.f32 %v314_v56, %v300_v52  ;;  %795 = vmatprep.subr.mxu0 %v1116_v59  ;;  %838 = vmatprep.subr.mxu1 %v1116_v59  ;;  %v245_v52 = vadd.f32 %v230_v49, %v229_v48 }
  0x2d   : > { %796 = vmatpush3.msra.mxu0 %v1116_v59  ;;  %854 = vmatpush3.msra.mxu1 %v1116_v59 }
  0x2e   : > { %v316_v60 = vadd.f32 %v315_v58, %v301_v55  ;;  %797 = vmatprep.subr.mxu0 %v1128_v9  ;;  %839 = vmatprep.subr.mxu1 %v1128_v9  ;;  %v232_v55 = vmul.f32 %v1109_v57, %v1109_v57  ;;  %v233_v58 = vmul.f32 %v1102_v54, %v1102_v54 }
  0x2f   : > { %798 = vmatpush3.msra.mxu0 %v1128_v9  ;;  %855 = vmatpush3.msra.mxu1 %v1128_v9  ;;  %v237_v57 = vmul.f32 %v1060_v38, %v1060_v38  ;;  %v238_v54 = vmul.f32 %v1048_v34, %v1048_v34  ;;  %v242_v38 = vmul.f32 %v1000_v18, %v1000_v18 }
  0x30   : > { %v317_v61 = vrot.slane %v316_v60, 4  ;;  %799 = vmatprep.subr.mxu0 %v1132_v12  ;;  %840 = vmatprep.subr.mxu1 %v1132_v12  ;;  %v243_v34 = vmul.f32 %v989_v14, %v989_v14 }
  0x31   : > { %800 = vmatpush3.msra.mxu0 %v1132_v12  ;;  %856 = vmatpush3.msra.mxu1 %v1132_v12 }
  0x32   : > { %v318_v62 = vadd.f32 %v317_v61, %v316_v60  ;;  %v234_v61 = vmul.f32 %v1094_v50, %v1094_v50  ;;  %v239_v50 = vmul.f32 %v1036_v30, %v1036_v30  ;;  %v244_v30 = vmul.f32 %v986_v13, %v986_v13 }
  0x34   : > { %v319_v63 = vrot.slane %v318_v62, 2 }
  0x36   : > { %v320_v4 = vadd.f32 %v319_v63, %v318_v62  ;;  %v235_v63 = vmul.f32 %v1084_v46, %v1084_v46  ;;  %v240_v46 = vmul.f32 %v1024_v26, %v1024_v26 }
  0x38   : > { %v321_v5 = vrot.slane %v320_v4, 1 }
  0x3a   : > { %v322_v6 = vadd.f32 %v321_v5, %v320_v4 }
  0x3c   : > { %v323_v8 = vmax.f32 %v322_v6, 1e-24 }
  0x3e   : > { %882 = vrsqrt.f32 %v323_v8 }
  0x4b   : > { %v883_v11 = vpop.eup %882 }
  0x4c   : > { %v325_v16 = vmul.f32 %v883_v11, %v953_v0  ;;  %v326_v17 = vmul.f32 %v883_v11, %v956_v1  ;;  %v338_v20 = vmul.f32 %v883_v11, %v1076_v43  ;;  %v339_v21 = vmul.f32 %v883_v11, %v284_v47 }
  0x4d   : > { %v340_v24 = vmul.f32 %v883_v11, %v285_v51  ;;  %v327_v0 = vmul.f32 %v883_v11, %v959_v2  ;;  %v328_v25 = vmul.f32 %v883_v11, %v962_v3  ;;  %v329_v1 = vmul.f32 %v883_v11, %v976_v7 }
  0x4e   : > { %357 = vxpose.xlu0.b32.start [1/16] %v325_v16, 128  ;;  %v330_v28 = vmul.f32 %v883_v11, %v981_v10  ;;  %v331_v29 = vmul.f32 %v883_v11, %v992_v15  ;;  %v332_v32 = vmul.f32 %v883_v11, %v1004_v19  ;;  %v333_v2 = vmul.f32 %v883_v11, %v1016_v23 }
  0x4f   : > { %v334_v33 = vmul.f32 %v883_v11, %v1028_v27  ;;  %v335_v3 = vmul.f32 %v883_v11, %v1040_v31  ;;  %v336_v7 = vmul.f32 %v883_v11, %v1052_v35  ;;  %v337_v10 = vmul.f32 %v883_v11, %v1064_v39 }
  0x50   : > { %v231_v51 = vmul.f32 %v1116_v59, %v1116_v59  ;;  %v236_v59 = vmul.f32 %v1072_v42, %v1072_v42  ;;  %v241_v42 = vmul.f32 %v1012_v22, %v1012_v22 }
  0x52   : > { %358 = vxpose.xlu0.b32.cont [2/16] %v326_v17, 128  ;;  %v246_v56 = vadd.f32 %v245_v52, %v231_v51 }
  0x54   : > { %v247_v60 = vadd.f32 %v246_v56, %v232_v55 }
  0x56   : > { %359 = vxpose.xlu0.b32.cont [3/16] %v327_v0, 128  ;;  %v248_v62 = vadd.f32 %v247_v60, %v233_v58 }
  0x58   : > { %v249_v4 = vadd.f32 %v248_v62, %v234_v61 }
  0x5a   : > { %360 = vxpose.xlu0.b32.cont [4/16] %v328_v25, 128  ;;  %v250_v5 = vadd.f32 %v249_v4, %v235_v63  ;;  %v910_v25 = vmov -inf  }
  0x5b   : > { %269 = vst [vmem:[#allocation2] sm:$0x1] %v910_v25 }
  0x5c   : > { %v251_v6 = vadd.f32 %v250_v5, %v236_v59 }
  0x5e   : > { %361 = vxpose.xlu0.b32.cont [5/16] %v329_v1, 128  ;;  %v252_v8 = vadd.f32 %v251_v6, %v237_v57 }
  0x60   : > { %v253_v9 = vadd.f32 %v252_v8, %v238_v54 }
  0x62   : > { %362 = vxpose.xlu0.b32.cont [6/16] %v330_v28, 128  ;;  %v254_v11 = vadd.f32 %v253_v9, %v239_v50 }
  0x64   : > { %v255_v12 = vadd.f32 %v254_v11, %v240_v46 }
  0x66   : > { %363 = vxpose.xlu0.b32.cont [7/16] %v331_v29, 128  ;;  %v256_v16 = vadd.f32 %v255_v12, %v241_v42 }
  0x68   : > { %v257_v17 = vadd.f32 %v256_v16, %v242_v38 }
  0x6a   : > { %364 = vxpose.xlu0.b32.cont [8/16] %v332_v32, 128 }
  0x6e   : > { %365 = vxpose.xlu0.b32.cont [9/16] %v333_v2, 128 }
  0x72   : > { %366 = vxpose.xlu0.b32.cont [10/16] %v334_v33, 128  ;;  %v535_v33 = vlaneseq }
  0x74   : > { %v536_v13 = vshrl.u32 %v535_v33, 7 }
  0x76   : > { %367 = vxpose.xlu0.b32.cont [11/16] %v335_v3, 128 }
  0x7a   : > { %368 = vxpose.xlu0.b32.cont [12/16] %v336_v7, 128 }
  0x7e   : > { %369 = vxpose.xlu0.b32.cont [13/16] %v337_v10, 128  ;;  %v542_v10 = vadd.s32 48, %v536_v13 }
  0x80   : > { %vm575_vm0 = vcmp.lt.s32.totalorder %v542_v10, 49 }
  0x82   : > { %370 = vxpose.xlu0.b32.cont [14/16] %v338_v20, 128  ;;  %v258_v20 = vadd.f32 %v257_v17, %v243_v34 }
  0x86   : > { %371 = vxpose.xlu0.b32.cont [15/16] %v339_v21, 128  ;;  %v259_v21 = vadd.f32 %v258_v20, %v244_v30 }
  0x8a   : > { %372 = vxpose.xlu0.b32.end [16/16] %v340_v24, 128  ;;  %v260_v24 = vrot.slane %v259_v21, 4 }
  0x8c   : > { %v261_v26 = vadd.f32 %v260_v24, %v259_v21 }
  0x8e   : > { %v262_v0 = vrot.slane %v261_v26, 2 }
  0x90   : > { %v263_v22 = vadd.f32 %v262_v0, %v261_v26 }
  0x92   : > { %v264_v1 = vrot.slane %v263_v22, 1 }
  0x94   : > { %v265_v28 = vadd.f32 %v264_v1, %v263_v22 }
  0x96   : > { %v266_v29 = vmax.f32 %v265_v28, 1e-24 }
  0x98   : > { %884 = vrsqrt.f32 %v266_v29 }
  0xa5   : > { %v885_v18 = vpop.eup %884 }
  0xa6   : > { %268 = vst [vmem:[#allocation3] sm:$0x1] %v885_v18 }
  0xad   : > { %v629_v61 = vld [vmem:[#allocation3] sm:$0x1] }
  0xca   : > { %v373_v15 = vpop.trf.xlu0 }
  0xcb   : > { %801 = vmatprep.mubr.f32.mxu0 %v373_v15 }
  0xce   : > { %v374_v19 = vpop.trf.xlu0 }
  0xcf   : > { %802 = vmatmul.mubr.f32.vlgmr.msra.gmra.mxu0 %v374_v19 }
  0xd2   : > { %v375_v23 = vpop.trf.xlu0 }
  0xd3   : > { %804 = vmatprep.mubr.f32.mxu0 %v375_v23 }
  0xd6   : > { %v376_v27 = vpop.trf.xlu0 }
  0xd7   : > { %805 = vmatmul.mubr.f32.gmra.mxu0 %v376_v27 }
  0xda   : > { %v377_v36 = vpop.trf.xlu0 }
  0xdb   : > { %807 = vmatprep.mubr.f32.mxu0 %v377_v36 }
  0xde   : > { %v378_v31 = vpop.trf.xlu0 }
  0xdf   : > { %808 = vmatmul.mubr.f32.gmra.mxu0 %v378_v31 }
  0xe2   : > { %v379_v35 = vpop.trf.xlu0 }
  0xe3   : > { %810 = vmatprep.mubr.f32.mxu0 %v379_v35 }
  0xe6   : > { %v380_v37 = vpop.trf.xlu0 }
  0xe7   : > { %811 = vmatmul.mubr.f32.gmra.mxu0 %v380_v37 }
  0xea   : > { %v381_v39 = vpop.trf.xlu0 }
  0xeb   : > { %813 = vmatprep.mubr.f32.mxu1 %v381_v39 }
  0xee   : > { %v382_v40 = vpop.trf.xlu0 }
  0xef   : > { %814 = vmatmul.mubr.f32.vlgmr.msra.gmra.mxu1 %v382_v40 }
  0xf2   : > { %v383_v41 = vpop.trf.xlu0 }
  0xf3   : > { %816 = vmatprep.mubr.f32.mxu1 %v383_v41 }
  0xf6   : > { %v384_v43 = vpop.trf.xlu0 }
  0xf7   : > { %817 = vmatmul.mubr.f32.gmra.mxu1 %v384_v43 }
  0xfa   : > { %v385_v44 = vpop.trf.xlu0 }
  0xfb   : > { %819 = vmatprep.mubr.f32.mxu1 %v385_v44 }
  0xfe   : > { %v386_v45 = vpop.trf.xlu0 }
  0xff   : > { %820 = vmatmul.mubr.f32.gmra.mxu1 %v386_v45 }
 0x102   : > { %v387_v47 = vpop.trf.xlu0 }
 0x103   : > { %822 = vmatprep.mubr.f32.mxu1 %v387_v47 }
 0x106   : > { %v388_v53 = vpop.trf.xlu0 }
 0x107   : > { %823 = vmatmul.mubr.f32.gmra.mxu1 %v388_v53  ;;  %v601_v53 = vld [vmem:[#allocation2] sm:$0x1] }
 0x18f   : > { %v803_v32 = vpop.f32.mrf.mxu0 }
 0x191   : > { %v455_v14 = vpop.f32.mrf.mxu0 }
 0x197   : > { %v806_v2 = vpop.f32.mrf.mxu0 }
 0x199   : > { %v465_v3 = vpop.f32.mrf.mxu0 }
 0x19f   : > { %v809_v7 = vpop.f32.mrf.mxu0 }
 0x1a0   : > { %v603_v31 = vmax.f32 %v803_v32, %v809_v7 }
 0x1a1   : > { %v475_v15 = vpop.f32.mrf.mxu0 }
 0x1a2   : > { %v602_v23 = vmax.f32 %v455_v14, %v475_v15 }
 0x1a4   : > { %v614_v37 = vmax.f32 %v602_v23, %v603_v31 }
 0x1a7   : > { %v812_v19 = vpop.f32.mrf.mxu0 }
 0x1a9   : > { %v485_v27 = vpop.f32.mrf.mxu0 }
 0x1aa   : > { %v591_v36 = vsel %vm575_vm0, %v485_v27, -inf }
 0x1ab   : > { %v604_v35 = vmax.f32 %v465_v3, %v591_v36 }
 0x1ad   : > { %v615_v39 = vmax.f32 %v604_v35, %v806_v2 }
 0x1af   : > { %v616_v40 = vmax.f32 %v614_v37, %v615_v39  ;;  %v815_v41 = vpop.f32.mrf.mxu1 }
 0x1b1   : > { %v617_v43 = vrot.slane %v616_v40, 4  ;;  %v495_v44 = vpop.f32.mrf.mxu1 }
 0x1b3   : > { %v618_v45 = vmax.f32 %v616_v40, %v617_v43 }
 0x1b5   : > { %v619_v47 = vrot.slane %v618_v45, 2 }
 0x1b7   : > { %v620_v48 = vmax.f32 %v618_v45, %v619_v47  ;;  %v818_v49 = vpop.f32.mrf.mxu1 }
 0x1b9   : > { %v621_v51 = vrot.slane %v620_v48, 1  ;;  %v505_v52 = vpop.f32.mrf.mxu1 }
 0x1bb   : > { %v622_v55 = vmax.f32 %v620_v48, %v621_v51 }
 0x1bd   : > { %v623_v56 = vmax.f32 %v601_v53, %v622_v55 }
 0x1bf   : > { %624 = vst [vmem:[#allocation2] sm:$0x1] %v623_v56  ;;  %v821_v58 = vpop.f32.mrf.mxu1 }
 0x1c1   : > { %v515_v60 = vpop.f32.mrf.mxu1 }
 0x1c6   : > { %v628_v62 = vld [vmem:[#allocation2] sm:$0x1] }
 0x1c7   : > { %v630_v63 = vmul.f32 %v629_v61, %v628_v62  ;;  %v824_v4 = vpop.f32.mrf.mxu1 }
 0x1c9   : > { %631 = vst [vmem:[%s208_s22] sm:$0x1] %v630_v63  ;;  %v525_v59 = vpop.f32.mrf.mxu1 }
 0x1ca PF: > { %s12_s11 = sadd.s32 1, %s908_s11   ;;  %s1203_s9 = smov %s904_s10 }
 0x1cb   : > { %p9_p5 = scmp.ge.s32.totalorder %s12_s11, 4   ;;  %s1204_s10 = smov %s1206_s12 }
 0x1cd   :  { %11 = sbr.rel (!%p9_p5) target bundleno = 2 (0x2), region = 69 }

</bundles_post_ra>
